<compile_context>
chip_gen: v6e
topology: v6e:2x2x1
jax: 0.10.0
libtpu: 0.0.40
codegen_flags: <defaults>
</compile_context>

<pallas_src>
import functools

import jax
import jax.numpy as jnp
import numpy as np
from jax.experimental import pallas as pl
from jax.experimental.pallas import tpu as pltpu


# --------------------------------------------------------------------------
# device / feature probes (evaluated once, cached)
# --------------------------------------------------------------------------
@functools.lru_cache(maxsize=None)
def _device_kind():
    try:
        return jax.devices()[0].device_kind.lower()
    except Exception:
        return ""


def _has_bf16_vpu():
    k = _device_kind()
    return ("v6" in k) or ("v7" in k)


def _min_grid_steps():
    # v7x shards the "parallel" grid axis across 2 TensorCores.
    return 4 if "v7" in _device_kind() else 2


@functools.lru_cache(maxsize=None)
def _vmem_capacity_bytes():
    try:
        return int(pltpu.get_tpu_info().vmem_capacity_bytes)
    except Exception:
        return 64 << 20   # conservative (v7x per-TC)


@functools.lru_cache(maxsize=None)
def _single_buffer_weights_supported():
    """One-time probe: can constant-index weight inputs be single-buffered?"""
    if not hasattr(pl, "Buffered"):
        return False
    try:
        wspec = pl.BlockSpec((8, 128), lambda i: (0, 0),
                             pipeline_mode=pl.Buffered(buffer_count=1))

        def k(x_ref, w_ref, o_ref):
            o_ref[...] = x_ref[...] + w_ref[...]

        fn = pl.pallas_call(
            k,
            out_shape=jax.ShapeDtypeStruct((16, 128), jnp.float32),
            grid=(2,),
            in_specs=[pl.BlockSpec((8, 128), lambda i: (i, 0)), wspec],
            out_specs=pl.BlockSpec((8, 128), lambda i: (i, 0)),
            compiler_params=pltpu.CompilerParams(
                dimension_semantics=("parallel",)))
        jax.jit(fn).lower(jnp.zeros((16, 128), jnp.float32),
                          jnp.zeros((8, 128), jnp.float32)).compile()
        return True
    except Exception:
        return False


# --------------------------------------------------------------------------
# kernel
# --------------------------------------------------------------------------
def _residual_block_kernel(
    x_ref,                       # (NB, L, D)  f32
    ln1_g_ref, ln1_b_ref,        # (1, D)      f32
    w_in_ref, b_in_ref,          # (D, 3D) bf16, (1, 3D) f32  (Q cols pre-scaled)
    w_out_ref, b_out_ref,        # (D, D)  bf16, (1, D)  f32
    ln2_g_ref, ln2_b_ref,        # (1, D)      f32
    w_fc_ref, b_fc_ref,          # (D, 4D) bf16, (1, 4D) f32
    w_proj_ref, b_proj_ref,      # (4D, D) bf16, (1, D)  f32
    o_ref,                       # (NB, L, D)
    qkv_scr,                     # (NB, L, 3D) bf16 scratch
    attn_scr,                    # (NB, L, D)  bf16 scratch
    *, n_head, valid_len, gelu_bf16, eps=1e-5,
):
    NB, L, D = x_ref.shape
    Dh = D // n_head
    f32, bf16 = jnp.float32, jnp.bfloat16
    cdim = (((1,), (1,)), ((), ()))   # contract last dims: q @ k^T

    def layer_norm(v, g, b):          # f32 elementwise (safe on v5e)
        mu = jnp.mean(v, axis=-1, keepdims=True)
        var = jnp.mean((v - mu) ** 2, axis=-1, keepdims=True)
        return (v - mu) * jax.lax.rsqrt(var + eps) * g + b

    x = x_ref[...].astype(f32)                        # (NB, L, D)
    x2d = x.reshape(NB * L, D)

    # ---------- qkv projection (bf16 x bf16 -> f32 on the MXU) ----------
    ln1 = layer_norm(x2d, ln1_g_ref[0], ln1_b_ref[0])
    qkv = jnp.dot(ln1.astype(bf16), w_in_ref[...],
                  preferred_element_type=f32) + b_in_ref[0]     # (NB*L, 3D)
    qkv_scr[...] = qkv.reshape(NB, L, 3 * D).astype(bf16)

    # Additive key mask for padded sequence positions (static decision).
    if valid_len < L:
        col = jax.lax.broadcasted_iota(jnp.int32, (L, L), 1)
        key_mask = jnp.where(col < valid_len, 0.0, -1e30).astype(f32)
    else:
        key_mask = None

    # ---------- attention: fori over batch, static unroll over heads ----------
    def batch_body(b, carry):
        qkv_b = qkv_scr[b]                            # (L, 3D) bf16
        head_outs = []
        for h in range(n_head):                       # static per-head lane slices
            q = qkv_b[:, 0 * D + h * Dh: 0 * D + (h + 1) * Dh]   # pre-scaled
            k = qkv_b[:, 1 * D + h * Dh: 1 * D + (h + 1) * Dh]
            v = qkv_b[:, 2 * D + h * Dh: 2 * D + (h + 1) * Dh]
            s = jax.lax.dot_general(q, k, cdim,
                                    preferred_element_type=f32)  # (L, L) f32
            if key_mask is not None:
                s = s + key_mask
            s = s - jnp.max(s, axis=-1, keepdims=True)
            p = jnp.exp(s)                                        # f32
            p = p * pl.reciprocal(jnp.sum(p, axis=-1, keepdims=True),
                                  approx=True)
            oh = jnp.dot(p.astype(bf16), v,
                         preferred_element_type=f32)              # (L, Dh)
            head_outs.append(oh.astype(bf16))
        attn_scr[b] = jnp.concatenate(head_outs, axis=-1)         # (L, D) bf16
        return carry

    jax.lax.fori_loop(0, NB, batch_body, 0)

    # ---------- single full-K out-projection over all batches/heads ----------
    att = jnp.dot(attn_scr[...].reshape(NB * L, D), w_out_ref[...],
                  preferred_element_type=f32) + b_out_ref[0]      # (NB*L, D)
    x1 = x2d + att

    # ---------- MLP branch ----------
    ln2 = layer_norm(x1, ln2_g_ref[0], ln2_b_ref[0])
    hmid = jnp.dot(ln2.astype(bf16), w_fc_ref[...],
                   preferred_element_type=f32) + b_fc_ref[0]      # (NB*L, 4D)
    if gelu_bf16:
        hb = hmid.astype(bf16)                        # v6e/v7x: bf16 VPU/EUP
        act = hb * jax.nn.sigmoid(1.702 * hb)
    else:
        act = (hmid * jax.nn.sigmoid(1.702 * hmid)).astype(bf16)  # v5e: f32 math
    y = jnp.dot(act, w_proj_ref[...],
                preferred_element_type=f32) + b_proj_ref[0]

    o_ref[...] = (x1 + y).reshape(NB, L, D).astype(o_ref.dtype)


# --------------------------------------------------------------------------
# wrapper
# --------------------------------------------------------------------------
def prepare_params(params, n_head):
    """One-time weight preprocessing.  Call once and cache the result; do NOT
    call per forward step (it does full-weight casts / scale folding)."""
    D = int(params["w_in"].shape[0])
    scale = jnp.float32((D // n_head) ** -0.5)
    # Fold the 1/sqrt(Dh) attention scale into the Q columns of w_in / b_in.
    w_in = params["w_in"].astype(jnp.float32).at[:, :D].multiply(scale)
    b_in = params["b_in"].astype(jnp.float32).at[:, :D].multiply(scale)
    f32 = lambda a: a.astype(jnp.float32)
    bf16 = lambda a: a.astype(jnp.bfloat16)
    return (
        f32(params["ln1_g"]), f32(params["ln1_b"]),
        bf16(w_in), b_in,
        bf16(params["w_out"]), f32(params["b_out"]),
        f32(params["ln2_g"]), f32(params["ln2_b"]),
        bf16(params["w_fc"]), f32(params["b_fc"]),
        bf16(params["w_proj"]), f32(params["b_proj"]),
    )


def _pick_batch_block(N, L, *, target_rows=512, min_steps=2):
    """Largest divisor of N with ~target_rows rows/step, keeping >= min_steps
    grid steps when the batch allows it."""
    nb = max(1, min(N, max(1, target_rows // max(L, 1))))
    if N >= min_steps:
        nb = min(nb, max(1, N // min_steps))
    while N % nb:
        nb -= 1
    return nb


def residual_attention_block(x_in, prepared, n_head, *, batch_major=False):
    """CLIP ResidualAttentionBlock forward (attn_mask=None, return_tokens=False).

    x_in: (L, N, D) by default (module convention) or (N, L, D) if
    batch_major=True (skips the two wrapper HBM transposes).
    prepared: tuple from prepare_params() (or a raw param dict, converted here
    — prefer caching prepare_params() outside the call)."""
    if isinstance(prepared, dict):
        prepared = prepare_params(prepared, n_head)
    param_arrays = list(prepared)

    if batch_major:
        x = x_in
        N, L, D = x.shape
    else:
        L, N, D = x_in.shape
        # TODO(synk): replace with a seq-major BlockSpec read + in-VMEM relayout.
        x = jnp.transpose(x_in, (1, 0, 2))            # (N, L, D)

    # Pad seq to a sublane multiple so score/prob tiles are dense; padded key
    # columns are masked to -inf inside the kernel.
    L_pad = -(-L // 8) * 8
    if L_pad != L:
        x = jnp.pad(x, ((0, 0), (0, L_pad - L), (0, 0)))

    NB = _pick_batch_block(N, L_pad, min_steps=_min_grid_steps())
    grid = (N // NB,)

    single_buf = _single_buffer_weights_supported()

    def wspec(a):
        imap = lambda n, _nd=a.ndim: (0,) * _nd
        if single_buf:
            # Constant index_map -> double-buffering the weights is pure VMEM waste.
            return pl.BlockSpec(a.shape, imap,
                                pipeline_mode=pl.Buffered(buffer_count=1))
        return pl.BlockSpec(a.shape, imap)

    # VMEM budget (generation-aware clamp).
    weight_bytes = sum(int(a.size) * a.dtype.itemsize for a in param_arrays)
    act_block = NB * L_pad * D * 4
    est = ((1 if single_buf else 2) * weight_bytes
           + 4 * act_block                            # x / out blocks, double-buffered
           + NB * L_pad * 3 * D * (2 + 4)             # qkv scratch (bf16) + f32 transient
           + NB * L_pad * D * 2                       # attn scratch (bf16)
           + NB * L_pad * 4 * D * 4                   # MLP hidden (f32)
           + 4 * L_pad * L_pad * 4)                   # one head's scores/probs + slack
    cap = _vmem_capacity_bytes()
    vmem_limit = int(min(max(int(est * 1.25) + (2 << 20), 32 << 20),
                         cap - (4 << 20)))

    kernel = functools.partial(_residual_block_kernel, n_head=n_head,
                               valid_len=L, gelu_bf16=_has_bf16_vpu())

    out = pl.pallas_call(
        kernel,
        out_shape=jax.ShapeDtypeStruct((N, L_pad, D), x.dtype),
        grid=grid,
        in_specs=[pl.BlockSpec((NB, L_pad, D), lambda n: (n, 0, 0))]
                 + [wspec(a) for a in param_arrays],
        out_specs=pl.BlockSpec((NB, L_pad, D), lambda n: (n, 0, 0)),
        scratch_shapes=[pltpu.VMEM((NB, L_pad, 3 * D), jnp.bfloat16),
                        pltpu.VMEM((NB, L_pad, D), jnp.bfloat16)],
        compiler_params=pltpu.CompilerParams(
            dimension_semantics=("parallel",),        # batch axis -> v7x 2 TCs
            vmem_limit_bytes=vmem_limit),
    )(x, *param_arrays)

    if L_pad != L:
        out = out[:, :L, :]
    return out if batch_major else jnp.transpose(out, (1, 0, 2))


# --------------------------------------------------------------------------
# reference + demo
# --------------------------------------------------------------------------
def make_params(key, d_model):
    ks = jax.random.split(key, 8)
    D = d_model
    return {
        "ln1_g": 1.0 + 0.01 * jax.random.normal(ks[0], (1, D), jnp.float32),
        "ln1_b": 0.01 * jax.random.normal(ks[1], (1, D), jnp.float32),
        "w_in": 0.05 * jax.random.normal(ks[2], (D, 3 * D), jnp.float32),
        "b_in": 0.01 * jax.random.normal(ks[3], (1, 3 * D), jnp.float32),
        "w_out": 0.05 * jax.random.normal(ks[4], (D, D), jnp.float32),
        "b_out": jnp.zeros((1, D), jnp.float32),
        "ln2_g": jnp.ones((1, D), jnp.float32),
        "ln2_b": jnp.zeros((1, D), jnp.float32),
        "w_fc": 0.05 * jax.random.normal(ks[5], (D, 4 * D), jnp.float32),
        "b_fc": 0.01 * jax.random.normal(ks[6], (1, 4 * D), jnp.float32),
        "w_proj": 0.05 * jax.random.normal(ks[7], (4 * D, D), jnp.float32),
        "b_proj": jnp.zeros((1, D), jnp.float32),
    }


def ref_forward(x_lnd, p, n_head):
    """Pure-JAX f32 reference mirroring the PyTorch module (return_tokens=False)."""
    def ln(v, g, b):
        mu = v.mean(-1, keepdims=True)
        var = ((v - mu) ** 2).mean(-1, keepdims=True)
        return (v - mu) / jnp.sqrt(var + 1e-5) * g[0] + b[0]

    L, N, D = x_lnd.shape
    Dh = D // n_head
    h1 = ln(x_lnd, p["ln1_g"], p["ln1_b"])
    qkv = h1 @ p["w_in"] + p["b_in"][0]
    q, k, v = jnp.split(qkv, 3, axis=-1)

    def heads(t):  # (L,N,D) -> (N,H,L,Dh)
        return t.reshape(L, N, n_head, Dh).transpose(1, 2, 0, 3)

    qh = heads(q) * (Dh ** -0.5)
    kh, vh = heads(k), heads(v)
    s = jnp.einsum('nhld,nhmd->nhlm', qh, kh)
    pm = jax.nn.softmax(s, axis=-1)
    o = jnp.einsum('nhlm,nhmd->nhld', pm, vh).transpose(2, 0, 1, 3).reshape(L, N, D)
    att = o @ p["w_out"] + p["b_out"][0]
    x1 = x_lnd + att
    h2 = ln(x1, p["ln2_g"], p["ln2_b"])
    m = h2 @ p["w_fc"] + p["b_fc"][0]
    m = m * jax.nn.sigmoid(1.702 * m)
    return x1 + m @ p["w_proj"] + p["b_proj"][0]


if __name__ == "__main__":
    L, N, D, H = 8, 2, 32, 4    # seq, batch, d_model, n_head

    key = jax.random.PRNGKey(0)
    kx, kp = jax.random.split(key)
    x = jax.random.normal(kx, (L, N, D), jnp.float32)
    params = make_params(kp, D)

    prepared = prepare_params(params, H)   # one-time weight prep (cache outside calls)

    out = residual_attention_block(x, prepared, H)
    out = jax.block_until_ready(out)

    ref = ref_forward(x, params, H)
    # bf16 weights/activations + approx reciprocal -> loosened tolerance vs f32 ref.
    np.testing.assert_allclose(np.asarray(out), np.asarray(ref),
                               rtol=2e-2, atol=2e-2)
    print("KERNEL_OK")
</pallas_src>

<mosaic_0001>
module attributes {stable_mosaic.version = 11 : i64} {
  func.func @_residual_block_kernel(%arg0: i32, %arg1: memref<1x8x32xf32, #tpu.memory_space<vmem>>, %arg2: memref<1x32xf32, #tpu.memory_space<vmem>>, %arg3: memref<1x32xf32, #tpu.memory_space<vmem>>, %arg4: memref<32x96xbf16, #tpu.memory_space<vmem>>, %arg5: memref<1x96xf32, #tpu.memory_space<vmem>>, %arg6: memref<32x32xbf16, #tpu.memory_space<vmem>>, %arg7: memref<1x32xf32, #tpu.memory_space<vmem>>, %arg8: memref<1x32xf32, #tpu.memory_space<vmem>>, %arg9: memref<1x32xf32, #tpu.memory_space<vmem>>, %arg10: memref<32x128xbf16, #tpu.memory_space<vmem>>, %arg11: memref<1x128xf32, #tpu.memory_space<vmem>>, %arg12: memref<128x32xbf16, #tpu.memory_space<vmem>>, %arg13: memref<1x32xf32, #tpu.memory_space<vmem>>, %arg14: memref<1x8x32xf32, #tpu.memory_space<vmem>>, %arg15: memref<1x8x96xbf16, #tpu.memory_space<vmem>>, %arg16: memref<1x8x32xbf16, #tpu.memory_space<vmem>>) attributes {dimension_semantics = [#tpu.dimension_semantics<parallel>], iteration_bounds = array<i64: 2>, scalar_prefetch = 0 : i64, scratch_operands = 2 : i64, tpu.core_type = #tpu.core_type<tc>, window_params = [{transform_indices = @transform_0, window_bounds = array<i64: 1, 8, 32>}, {pipeline_mode = #tpu.pipeline_mode<synchronous>, transform_indices = @transform_1, window_bounds = array<i64: 1, 32>}, {pipeline_mode = #tpu.pipeline_mode<synchronous>, transform_indices = @transform_2, window_bounds = array<i64: 1, 32>}, {pipeline_mode = #tpu.pipeline_mode<synchronous>, transform_indices = @transform_3, window_bounds = array<i64: 32, 96>}, {pipeline_mode = #tpu.pipeline_mode<synchronous>, transform_indices = @transform_4, window_bounds = array<i64: 1, 96>}, {pipeline_mode = #tpu.pipeline_mode<synchronous>, transform_indices = @transform_5, window_bounds = array<i64: 32, 32>}, {pipeline_mode = #tpu.pipeline_mode<synchronous>, transform_indices = @transform_6, window_bounds = array<i64: 1, 32>}, {pipeline_mode = #tpu.pipeline_mode<synchronous>, transform_indices = @transform_7, window_bounds = array<i64: 1, 32>}, {pipeline_mode = #tpu.pipeline_mode<synchronous>, transform_indices = @transform_8, window_bounds = array<i64: 1, 32>}, {pipeline_mode = #tpu.pipeline_mode<synchronous>, transform_indices = @transform_9, window_bounds = array<i64: 32, 128>}, {pipeline_mode = #tpu.pipeline_mode<synchronous>, transform_indices = @transform_10, window_bounds = array<i64: 1, 128>}, {pipeline_mode = #tpu.pipeline_mode<synchronous>, transform_indices = @transform_11, window_bounds = array<i64: 128, 32>}, {pipeline_mode = #tpu.pipeline_mode<synchronous>, transform_indices = @transform_12, window_bounds = array<i64: 1, 32>}, {transform_indices = @transform_13, window_bounds = array<i64: 1, 8, 32>}]} {
    %c0 = arith.constant 0 : index
    %c0_0 = arith.constant 0 : index
    %c0_1 = arith.constant 0 : index
    %0 = vector.load %arg1[%c0, %c0_0, %c0_1] : memref<1x8x32xf32, #tpu.memory_space<vmem>>, vector<1x8x32xf32>
    %1 = vector.shape_cast %0 : vector<1x8x32xf32> to vector<8x32xf32>
    %c0_2 = arith.constant 0 : index
    %c0_3 = arith.constant 0 : index
    %2 = vector.load %arg2[%c0_2, %c0_3] : memref<1x32xf32, #tpu.memory_space<vmem>>, vector<1x32xf32>
    %3 = vector.shape_cast %2 : vector<1x32xf32> to vector<32xf32>
    %c0_4 = arith.constant 0 : index
    %c0_5 = arith.constant 0 : index
    %4 = vector.load %arg3[%c0_4, %c0_5] : memref<1x32xf32, #tpu.memory_space<vmem>>, vector<1x32xf32>
    %5 = vector.shape_cast %4 : vector<1x32xf32> to vector<32xf32>
    %cst = arith.constant dense<0.000000e+00> : vector<8xf32>
    %6 = vector.multi_reduction <add>, %1, %cst [1] : vector<8x32xf32> to vector<8xf32>
    %7 = vector.shape_cast %6 : vector<8xf32> to vector<8x1xf32>
    %cst_6 = arith.constant 3.200000e+01 : f32
    %8 = vector.broadcast %cst_6 : f32 to vector<8x1xf32>
    %9 = arith.divf %7, %8 : vector<8x1xf32>
    %10 = vector.broadcast %9 : vector<8x1xf32> to vector<8x32xf32>
    %11 = arith.subf %1, %10 : vector<8x32xf32>
    %12 = arith.mulf %11, %11 : vector<8x32xf32>
    %cst_7 = arith.constant dense<0.000000e+00> : vector<8xf32>
    %13 = vector.multi_reduction <add>, %12, %cst_7 [1] : vector<8x32xf32> to vector<8xf32>
    %14 = vector.shape_cast %13 : vector<8xf32> to vector<8x1xf32>
    %cst_8 = arith.constant 3.200000e+01 : f32
    %15 = vector.broadcast %cst_8 : f32 to vector<8x1xf32>
    %16 = arith.divf %14, %15 : vector<8x1xf32>
    %17 = vector.broadcast %9 : vector<8x1xf32> to vector<8x32xf32>
    %18 = arith.subf %1, %17 : vector<8x32xf32>
    %cst_9 = arith.constant 9.99999974E-6 : f32
    %19 = vector.broadcast %cst_9 : f32 to vector<8x1xf32>
    %20 = arith.addf %16, %19 : vector<8x1xf32>
    %21 = math.rsqrt %20 : vector<8x1xf32>
    %22 = vector.broadcast %21 : vector<8x1xf32> to vector<8x32xf32>
    %23 = arith.mulf %18, %22 : vector<8x32xf32>
    %24 = vector.shape_cast %3 : vector<32xf32> to vector<1x32xf32>
    %25 = vector.broadcast %24 : vector<1x32xf32> to vector<8x32xf32>
    %26 = arith.mulf %23, %25 : vector<8x32xf32>
    %27 = vector.shape_cast %5 : vector<32xf32> to vector<1x32xf32>
    %28 = vector.broadcast %27 : vector<1x32xf32> to vector<8x32xf32>
    %29 = arith.addf %26, %28 : vector<8x32xf32>
    %30 = arith.truncf %29 : vector<8x32xf32> to vector<8x32xbf16>
    %c0_10 = arith.constant 0 : index
    %c0_11 = arith.constant 0 : index
    %31 = vector.load %arg4[%c0_10, %c0_11] : memref<32x96xbf16, #tpu.memory_space<vmem>>, vector<32x96xbf16>
    %cst_12 = arith.constant dense<0.000000e+00> : vector<8x96xf32>
    %32 = tpu.matmul %30, %31, %cst_12 {dimension_numbers = #tpu.dot_dimension_numbers<[1], [0], [0], [1], [0, 0, 1, 1], [], []>} : vector<8x32xbf16>, vector<32x96xbf16>, vector<8x96xf32> -> vector<8x96xf32>
    %c0_13 = arith.constant 0 : index
    %c0_14 = arith.constant 0 : index
    %33 = vector.load %arg5[%c0_13, %c0_14] : memref<1x96xf32, #tpu.memory_space<vmem>>, vector<1x96xf32>
    %34 = vector.shape_cast %33 : vector<1x96xf32> to vector<96xf32>
    %35 = vector.shape_cast %34 : vector<96xf32> to vector<1x96xf32>
    %36 = vector.broadcast %35 : vector<1x96xf32> to vector<8x96xf32>
    %37 = arith.addf %32, %36 : vector<8x96xf32>
    %38 = vector.shape_cast %37 : vector<8x96xf32> to vector<1x8x96xf32>
    %39 = arith.truncf %38 : vector<1x8x96xf32> to vector<1x8x96xbf16>
    %c0_15 = arith.constant 0 : index
    %c0_16 = arith.constant 0 : index
    %c0_17 = arith.constant 0 : index
    %40 = vector.load %arg15[%c0_15, %c0_16, %c0_17] : memref<1x8x96xbf16, #tpu.memory_space<vmem>>, vector<1x8x96xbf16>
    tpu.vector_store %arg15[%c0_15, %c0_16, %c0_17], %39 {strides = array<i32>} : memref<1x8x96xbf16, #tpu.memory_space<vmem>>, vector<1x8x96xbf16>,
    %c0_i32 = arith.constant 0 : i32
    %41 = arith.index_cast %c0_i32 : i32 to index
    %c0_18 = arith.constant 0 : index
    %c0_19 = arith.constant 0 : index
    %42 = vector.load %arg15[%41, %c0_18, %c0_19] : memref<1x8x96xbf16, #tpu.memory_space<vmem>>, vector<1x8x96xbf16>
    %43 = vector.shape_cast %42 : vector<1x8x96xbf16> to vector<8x96xbf16>
    %44 = vector.extract_strided_slice %43 {offsets = [0, 0], sizes = [8, 8], strides = [1, 1]} : vector<8x96xbf16> to vector<8x8xbf16>
    %45 = vector.extract_strided_slice %43 {offsets = [0, 32], sizes = [8, 8], strides = [1, 1]} : vector<8x96xbf16> to vector<8x8xbf16>
    %46 = vector.extract_strided_slice %43 {offsets = [0, 64], sizes = [8, 8], strides = [1, 1]} : vector<8x96xbf16> to vector<8x8xbf16>
    %cst_20 = arith.constant dense<0.000000e+00> : vector<8x8xf32>
    %47 = tpu.matmul %44, %45, %cst_20 {dimension_numbers = #tpu.dot_dimension_numbers<[1], [1], [0], [0], [0, 0, 1, 0], [], []>} : vector<8x8xbf16>, vector<8x8xbf16>, vector<8x8xf32> -> vector<8x8xf32>
    %cst_21 = arith.constant dense<0xFF800000> : vector<8xf32>
    %48 = vector.multi_reduction <maximumf>, %47, %cst_21 [1] : vector<8x8xf32> to vector<8xf32>
    %49 = vector.shape_cast %48 : vector<8xf32> to vector<8x1xf32>
    %50 = vector.broadcast %49 : vector<8x1xf32> to vector<8x8xf32>
    %51 = arith.subf %47, %50 : vector<8x8xf32>
    %52 = math.exp %51 : vector<8x8xf32>
    %cst_22 = arith.constant dense<0.000000e+00> : vector<8xf32>
    %53 = vector.multi_reduction <add>, %52, %cst_22 [1] : vector<8x8xf32> to vector<8xf32>
    %54 = vector.shape_cast %53 : vector<8xf32> to vector<8x1xf32>
    %55 = tpu.reciprocal %54 {approx = true} : vector<8x1xf32> -> vector<8x1xf32>
    %56 = vector.broadcast %55 : vector<8x1xf32> to vector<8x8xf32>
    %57 = arith.mulf %52, %56 : vector<8x8xf32>
    %58 = arith.truncf %57 : vector<8x8xf32> to vector<8x8xbf16>
    %cst_23 = arith.constant dense<0.000000e+00> : vector<8x8xf32>
    %59 = tpu.matmul %58, %46, %cst_23 {dimension_numbers = #tpu.dot_dimension_numbers<[1], [0], [0], [1], [0, 0, 1, 1], [], []>} : vector<8x8xbf16>, vector<8x8xbf16>, vector<8x8xf32> -> vector<8x8xf32>
    %60 = arith.truncf %59 : vector<8x8xf32> to vector<8x8xbf16>
    %61 = vector.extract_strided_slice %43 {offsets = [0, 8], sizes = [8, 8], strides = [1, 1]} : vector<8x96xbf16> to vector<8x8xbf16>
    %62 = vector.extract_strided_slice %43 {offsets = [0, 40], sizes = [8, 8], strides = [1, 1]} : vector<8x96xbf16> to vector<8x8xbf16>
    %63 = vector.extract_strided_slice %43 {offsets = [0, 72], sizes = [8, 8], strides = [1, 1]} : vector<8x96xbf16> to vector<8x8xbf16>
    %cst_24 = arith.constant dense<0.000000e+00> : vector<8x8xf32>
    %64 = tpu.matmul %61, %62, %cst_24 {dimension_numbers = #tpu.dot_dimension_numbers<[1], [1], [0], [0], [0, 0, 1, 0], [], []>} : vector<8x8xbf16>, vector<8x8xbf16>, vector<8x8xf32> -> vector<8x8xf32>
    %cst_25 = arith.constant dense<0xFF800000> : vector<8xf32>
    %65 = vector.multi_reduction <maximumf>, %64, %cst_25 [1] : vector<8x8xf32> to vector<8xf32>
    %66 = vector.shape_cast %65 : vector<8xf32> to vector<8x1xf32>
    %67 = vector.broadcast %66 : vector<8x1xf32> to vector<8x8xf32>
    %68 = arith.subf %64, %67 : vector<8x8xf32>
    %69 = math.exp %68 : vector<8x8xf32>
    %cst_26 = arith.constant dense<0.000000e+00> : vector<8xf32>
    %70 = vector.multi_reduction <add>, %69, %cst_26 [1] : vector<8x8xf32> to vector<8xf32>
    %71 = vector.shape_cast %70 : vector<8xf32> to vector<8x1xf32>
    %72 = tpu.reciprocal %71 {approx = true} : vector<8x1xf32> -> vector<8x1xf32>
    %73 = vector.broadcast %72 : vector<8x1xf32> to vector<8x8xf32>
    %74 = arith.mulf %69, %73 : vector<8x8xf32>
    %75 = arith.truncf %74 : vector<8x8xf32> to vector<8x8xbf16>
    %cst_27 = arith.constant dense<0.000000e+00> : vector<8x8xf32>
    %76 = tpu.matmul %75, %63, %cst_27 {dimension_numbers = #tpu.dot_dimension_numbers<[1], [0], [0], [1], [0, 0, 1, 1], [], []>} : vector<8x8xbf16>, vector<8x8xbf16>, vector<8x8xf32> -> vector<8x8xf32>
    %77 = arith.truncf %76 : vector<8x8xf32> to vector<8x8xbf16>
    %78 = vector.extract_strided_slice %43 {offsets = [0, 16], sizes = [8, 8], strides = [1, 1]} : vector<8x96xbf16> to vector<8x8xbf16>
    %79 = vector.extract_strided_slice %43 {offsets = [0, 48], sizes = [8, 8], strides = [1, 1]} : vector<8x96xbf16> to vector<8x8xbf16>
    %80 = vector.extract_strided_slice %43 {offsets = [0, 80], sizes = [8, 8], strides = [1, 1]} : vector<8x96xbf16> to vector<8x8xbf16>
    %cst_28 = arith.constant dense<0.000000e+00> : vector<8x8xf32>
    %81 = tpu.matmul %78, %79, %cst_28 {dimension_numbers = #tpu.dot_dimension_numbers<[1], [1], [0], [0], [0, 0, 1, 0], [], []>} : vector<8x8xbf16>, vector<8x8xbf16>, vector<8x8xf32> -> vector<8x8xf32>
    %cst_29 = arith.constant dense<0xFF800000> : vector<8xf32>
    %82 = vector.multi_reduction <maximumf>, %81, %cst_29 [1] : vector<8x8xf32> to vector<8xf32>
    %83 = vector.shape_cast %82 : vector<8xf32> to vector<8x1xf32>
    %84 = vector.broadcast %83 : vector<8x1xf32> to vector<8x8xf32>
    %85 = arith.subf %81, %84 : vector<8x8xf32>
    %86 = math.exp %85 : vector<8x8xf32>
    %cst_30 = arith.constant dense<0.000000e+00> : vector<8xf32>
    %87 = vector.multi_reduction <add>, %86, %cst_30 [1] : vector<8x8xf32> to vector<8xf32>
    %88 = vector.shape_cast %87 : vector<8xf32> to vector<8x1xf32>
    %89 = tpu.reciprocal %88 {approx = true} : vector<8x1xf32> -> vector<8x1xf32>
    %90 = vector.broadcast %89 : vector<8x1xf32> to vector<8x8xf32>
    %91 = arith.mulf %86, %90 : vector<8x8xf32>
    %92 = arith.truncf %91 : vector<8x8xf32> to vector<8x8xbf16>
    %cst_31 = arith.constant dense<0.000000e+00> : vector<8x8xf32>
    %93 = tpu.matmul %92, %80, %cst_31 {dimension_numbers = #tpu.dot_dimension_numbers<[1], [0], [0], [1], [0, 0, 1, 1], [], []>} : vector<8x8xbf16>, vector<8x8xbf16>, vector<8x8xf32> -> vector<8x8xf32>
    %94 = arith.truncf %93 : vector<8x8xf32> to vector<8x8xbf16>
    %95 = vector.extract_strided_slice %43 {offsets = [0, 24], sizes = [8, 8], strides = [1, 1]} : vector<8x96xbf16> to vector<8x8xbf16>
    %96 = vector.extract_strided_slice %43 {offsets = [0, 56], sizes = [8, 8], strides = [1, 1]} : vector<8x96xbf16> to vector<8x8xbf16>
    %97 = vector.extract_strided_slice %43 {offsets = [0, 88], sizes = [8, 8], strides = [1, 1]} : vector<8x96xbf16> to vector<8x8xbf16>
    %cst_32 = arith.constant dense<0.000000e+00> : vector<8x8xf32>
    %98 = tpu.matmul %95, %96, %cst_32 {dimension_numbers = #tpu.dot_dimension_numbers<[1], [1], [0], [0], [0, 0, 1, 0], [], []>} : vector<8x8xbf16>, vector<8x8xbf16>, vector<8x8xf32> -> vector<8x8xf32>
    %cst_33 = arith.constant dense<0xFF800000> : vector<8xf32>
    %99 = vector.multi_reduction <maximumf>, %98, %cst_33 [1] : vector<8x8xf32> to vector<8xf32>
    %100 = vector.shape_cast %99 : vector<8xf32> to vector<8x1xf32>
    %101 = vector.broadcast %100 : vector<8x1xf32> to vector<8x8xf32>
    %102 = arith.subf %98, %101 : vector<8x8xf32>
    %103 = math.exp %102 : vector<8x8xf32>
    %cst_34 = arith.constant dense<0.000000e+00> : vector<8xf32>
    %104 = vector.multi_reduction <add>, %103, %cst_34 [1] : vector<8x8xf32> to vector<8xf32>
    %105 = vector.shape_cast %104 : vector<8xf32> to vector<8x1xf32>
    %106 = tpu.reciprocal %105 {approx = true} : vector<8x1xf32> -> vector<8x1xf32>
    %107 = vector.broadcast %106 : vector<8x1xf32> to vector<8x8xf32>
    %108 = arith.mulf %103, %107 : vector<8x8xf32>
    %109 = arith.truncf %108 : vector<8x8xf32> to vector<8x8xbf16>
    %cst_35 = arith.constant dense<0.000000e+00> : vector<8x8xf32>
    %110 = tpu.matmul %109, %97, %cst_35 {dimension_numbers = #tpu.dot_dimension_numbers<[1], [0], [0], [1], [0, 0, 1, 1], [], []>} : vector<8x8xbf16>, vector<8x8xbf16>, vector<8x8xf32> -> vector<8x8xf32>
    %111 = arith.truncf %110 : vector<8x8xf32> to vector<8x8xbf16>
    %112 = tpu.concatenate %60, %77, %94, %111 in 1 : vector<8x8xbf16>, vector<8x8xbf16>, vector<8x8xbf16>, vector<8x8xbf16> -> vector<8x32xbf16>
    %113 = arith.index_cast %c0_i32 : i32 to index
    %c0_36 = arith.constant 0 : index
    %c0_37 = arith.constant 0 : index
    %114 = vector.load %arg16[%113, %c0_36, %c0_37] : memref<1x8x32xbf16, #tpu.memory_space<vmem>>, vector<1x8x32xbf16>
    %115 = vector.shape_cast %114 : vector<1x8x32xbf16> to vector<8x32xbf16>
    %116 = vector.shape_cast %112 : vector<8x32xbf16> to vector<1x8x32xbf16>
    tpu.vector_store %arg16[%113, %c0_36, %c0_37], %116 {strides = array<i32>} : memref<1x8x32xbf16, #tpu.memory_space<vmem>>, vector<1x8x32xbf16>,
    %c1_i32 = arith.constant 1 : i32
    %c0_38 = arith.constant 0 : index
    %c0_39 = arith.constant 0 : index
    %c0_40 = arith.constant 0 : index
    %117 = vector.load %arg16[%c0_38, %c0_39, %c0_40] : memref<1x8x32xbf16, #tpu.memory_space<vmem>>, vector<1x8x32xbf16>
    %118 = vector.shape_cast %117 : vector<1x8x32xbf16> to vector<8x32xbf16>
    %c0_41 = arith.constant 0 : index
    %c0_42 = arith.constant 0 : index
    %119 = vector.load %arg6[%c0_41, %c0_42] : memref<32x32xbf16, #tpu.memory_space<vmem>>, vector<32x32xbf16>
    %cst_43 = arith.constant dense<0.000000e+00> : vector<8x32xf32>
    %120 = tpu.matmul %118, %119, %cst_43 {dimension_numbers = #tpu.dot_dimension_numbers<[1], [0], [0], [1], [0, 0, 1, 1], [], []>} : vector<8x32xbf16>, vector<32x32xbf16>, vector<8x32xf32> -> vector<8x32xf32>
    %c0_44 = arith.constant 0 : index
    %c0_45 = arith.constant 0 : index
    %121 = vector.load %arg7[%c0_44, %c0_45] : memref<1x32xf32, #tpu.memory_space<vmem>>, vector<1x32xf32>
    %122 = vector.shape_cast %121 : vector<1x32xf32> to vector<32xf32>
    %123 = vector.shape_cast %122 : vector<32xf32> to vector<1x32xf32>
    %124 = vector.broadcast %123 : vector<1x32xf32> to vector<8x32xf32>
    %125 = arith.addf %120, %124 : vector<8x32xf32>
    %126 = arith.addf %1, %125 : vector<8x32xf32>
    %c0_46 = arith.constant 0 : index
    %c0_47 = arith.constant 0 : index
    %127 = vector.load %arg8[%c0_46, %c0_47] : memref<1x32xf32, #tpu.memory_space<vmem>>, vector<1x32xf32>
    %128 = vector.shape_cast %127 : vector<1x32xf32> to vector<32xf32>
    %c0_48 = arith.constant 0 : index
    %c0_49 = arith.constant 0 : index
    %129 = vector.load %arg9[%c0_48, %c0_49] : memref<1x32xf32, #tpu.memory_space<vmem>>, vector<1x32xf32>
    %130 = vector.shape_cast %129 : vector<1x32xf32> to vector<32xf32>
    %cst_50 = arith.constant dense<0.000000e+00> : vector<8xf32>
    %131 = vector.multi_reduction <add>, %126, %cst_50 [1] : vector<8x32xf32> to vector<8xf32>
    %132 = vector.shape_cast %131 : vector<8xf32> to vector<8x1xf32>
    %cst_51 = arith.constant 3.200000e+01 : f32
    %133 = vector.broadcast %cst_51 : f32 to vector<8x1xf32>
    %134 = arith.divf %132, %133 : vector<8x1xf32>
    %135 = vector.broadcast %134 : vector<8x1xf32> to vector<8x32xf32>
    %136 = arith.subf %126, %135 : vector<8x32xf32>
    %137 = arith.mulf %136, %136 : vector<8x32xf32>
    %cst_52 = arith.constant dense<0.000000e+00> : vector<8xf32>
    %138 = vector.multi_reduction <add>, %137, %cst_52 [1] : vector<8x32xf32> to vector<8xf32>
    %139 = vector.shape_cast %138 : vector<8xf32> to vector<8x1xf32>
    %cst_53 = arith.constant 3.200000e+01 : f32
    %140 = vector.broadcast %cst_53 : f32 to vector<8x1xf32>
    %141 = arith.divf %139, %140 : vector<8x1xf32>
    %142 = vector.broadcast %134 : vector<8x1xf32> to vector<8x32xf32>
    %143 = arith.subf %126, %142 : vector<8x32xf32>
    %cst_54 = arith.constant 9.99999974E-6 : f32
    %144 = vector.broadcast %cst_54 : f32 to vector<8x1xf32>
    %145 = arith.addf %141, %144 : vector<8x1xf32>
    %146 = math.rsqrt %145 : vector<8x1xf32>
    %147 = vector.broadcast %146 : vector<8x1xf32> to vector<8x32xf32>
    %148 = arith.mulf %143, %147 : vector<8x32xf32>
    %149 = vector.shape_cast %128 : vector<32xf32> to vector<1x32xf32>
    %150 = vector.broadcast %149 : vector<1x32xf32> to vector<8x32xf32>
    %151 = arith.mulf %148, %150 : vector<8x32xf32>
    %152 = vector.shape_cast %130 : vector<32xf32> to vector<1x32xf32>
    %153 = vector.broadcast %152 : vector<1x32xf32> to vector<8x32xf32>
    %154 = arith.addf %151, %153 : vector<8x32xf32>
    %155 = arith.truncf %154 : vector<8x32xf32> to vector<8x32xbf16>
    %c0_55 = arith.constant 0 : index
    %c0_56 = arith.constant 0 : index
    %156 = vector.load %arg10[%c0_55, %c0_56] : memref<32x128xbf16, #tpu.memory_space<vmem>>, vector<32x128xbf16>
    %cst_57 = arith.constant dense<0.000000e+00> : vector<8x128xf32>
    %157 = tpu.matmul %155, %156, %cst_57 {dimension_numbers = #tpu.dot_dimension_numbers<[1], [0], [0], [1], [0, 0, 1, 1], [], []>} : vector<8x32xbf16>, vector<32x128xbf16>, vector<8x128xf32> -> vector<8x128xf32>
    %c0_58 = arith.constant 0 : index
    %c0_59 = arith.constant 0 : index
    %158 = vector.load %arg11[%c0_58, %c0_59] : memref<1x128xf32, #tpu.memory_space<vmem>>, vector<1x128xf32>
    %159 = vector.shape_cast %158 : vector<1x128xf32> to vector<128xf32>
    %160 = vector.shape_cast %159 : vector<128xf32> to vector<1x128xf32>
    %161 = vector.broadcast %160 : vector<1x128xf32> to vector<8x128xf32>
    %162 = arith.addf %157, %161 : vector<8x128xf32>
    %cst_60 = arith.constant 1.702000e+00 : f32
    %163 = vector.broadcast %cst_60 : f32 to vector<8x128xf32>
    %164 = arith.mulf %163, %162 : vector<8x128xf32>
    %165 = arith.negf %164 : vector<8x128xf32>
    %166 = math.exp %165 : vector<8x128xf32>
    %cst_61 = arith.constant 1.000000e+00 : f32
    %167 = vector.broadcast %cst_61 : f32 to vector<8x128xf32>
    %168 = arith.addf %167, %166 : vector<8x128xf32>
    %169 = arith.divf %167, %168 : vector<8x128xf32>
    %170 = arith.mulf %162, %169 : vector<8x128xf32>
    %171 = arith.truncf %170 : vector<8x128xf32> to vector<8x128xbf16>
    %c0_62 = arith.constant 0 : index
    %c0_63 = arith.constant 0 : index
    %172 = vector.load %arg12[%c0_62, %c0_63] : memref<128x32xbf16, #tpu.memory_space<vmem>>, vector<128x32xbf16>
    %cst_64 = arith.constant dense<0.000000e+00> : vector<8x32xf32>
    %173 = tpu.matmul %171, %172, %cst_64 {dimension_numbers = #tpu.dot_dimension_numbers<[1], [0], [0], [1], [0, 0, 1, 1], [], []>} : vector<8x128xbf16>, vector<128x32xbf16>, vector<8x32xf32> -> vector<8x32xf32>
    %c0_65 = arith.constant 0 : index
    %c0_66 = arith.constant 0 : index
    %174 = vector.load %arg13[%c0_65, %c0_66] : memref<1x32xf32, #tpu.memory_space<vmem>>, vector<1x32xf32>
    %175 = vector.shape_cast %174 : vector<1x32xf32> to vector<32xf32>
    %176 = vector.shape_cast %175 : vector<32xf32> to vector<1x32xf32>
    %177 = vector.broadcast %176 : vector<1x32xf32> to vector<8x32xf32>
    %178 = arith.addf %173, %177 : vector<8x32xf32>
    %179 = arith.addf %126, %178 : vector<8x32xf32>
    %180 = vector.shape_cast %179 : vector<8x32xf32> to vector<1x8x32xf32>
    %c0_67 = arith.constant 0 : index
    %c0_68 = arith.constant 0 : index
    %c0_69 = arith.constant 0 : index
    %181 = vector.load %arg14[%c0_67, %c0_68, %c0_69] : memref<1x8x32xf32, #tpu.memory_space<vmem>>, vector<1x8x32xf32>
    tpu.vector_store %arg14[%c0_67, %c0_68, %c0_69], %180 {strides = array<i32>} : memref<1x8x32xf32, #tpu.memory_space<vmem>>, vector<1x8x32xf32>,
    return
  }
  func.func @transform_0(%arg0: i32) -> (i32, i32, i32) {
    %c0_i32 = arith.constant 0 : i32
    %c0_i32_0 = arith.constant 0 : i32
    %c0_i32_1 = arith.constant 0 : i32
    return %arg0, %c0_i32, %c0_i32_0 : i32, i32, i32
  }
  func.func @transform_1(%arg0: i32) -> (i32, i32) {
    %c0_i32 = arith.constant 0 : i32
    %c0_i32_0 = arith.constant 0 : i32
    %c0_i32_1 = arith.constant 0 : i32
    return %c0_i32, %c0_i32_0 : i32, i32
  }
  func.func @transform_2(%arg0: i32) -> (i32, i32) {
    %c0_i32 = arith.constant 0 : i32
    %c0_i32_0 = arith.constant 0 : i32
    %c0_i32_1 = arith.constant 0 : i32
    return %c0_i32, %c0_i32_0 : i32, i32
  }
  func.func @transform_3(%arg0: i32) -> (i32, i32) {
    %c0_i32 = arith.constant 0 : i32
    %c0_i32_0 = arith.constant 0 : i32
    %c0_i32_1 = arith.constant 0 : i32
    return %c0_i32, %c0_i32_0 : i32, i32
  }
  func.func @transform_4(%arg0: i32) -> (i32, i32) {
    %c0_i32 = arith.constant 0 : i32
    %c0_i32_0 = arith.constant 0 : i32
    %c0_i32_1 = arith.constant 0 : i32
    return %c0_i32, %c0_i32_0 : i32, i32
  }
  func.func @transform_5(%arg0: i32) -> (i32, i32) {
    %c0_i32 = arith.constant 0 : i32
    %c0_i32_0 = arith.constant 0 : i32
    %c0_i32_1 = arith.constant 0 : i32
    return %c0_i32, %c0_i32_0 : i32, i32
  }
  func.func @transform_6(%arg0: i32) -> (i32, i32) {
    %c0_i32 = arith.constant 0 : i32
    %c0_i32_0 = arith.constant 0 : i32
    %c0_i32_1 = arith.constant 0 : i32
    return %c0_i32, %c0_i32_0 : i32, i32
  }
  func.func @transform_7(%arg0: i32) -> (i32, i32) {
    %c0_i32 = arith.constant 0 : i32
    %c0_i32_0 = arith.constant 0 : i32
    %c0_i32_1 = arith.constant 0 : i32
    return %c0_i32, %c0_i32_0 : i32, i32
  }
  func.func @transform_8(%arg0: i32) -> (i32, i32) {
    %c0_i32 = arith.constant 0 : i32
    %c0_i32_0 = arith.constant 0 : i32
    %c0_i32_1 = arith.constant 0 : i32
    return %c0_i32, %c0_i32_0 : i32, i32
  }
  func.func @transform_9(%arg0: i32) -> (i32, i32) {
    %c0_i32 = arith.constant 0 : i32
    %c0_i32_0 = arith.constant 0 : i32
    %c0_i32_1 = arith.constant 0 : i32
    return %c0_i32, %c0_i32_0 : i32, i32
  }
  func.func @transform_10(%arg0: i32) -> (i32, i32) {
    %c0_i32 = arith.constant 0 : i32
    %c0_i32_0 = arith.constant 0 : i32
    %c0_i32_1 = arith.constant 0 : i32
    return %c0_i32, %c0_i32_0 : i32, i32
  }
  func.func @transform_11(%arg0: i32) -> (i32, i32) {
    %c0_i32 = arith.constant 0 : i32
    %c0_i32_0 = arith.constant 0 : i32
    %c0_i32_1 = arith.constant 0 : i32
    return %c0_i32, %c0_i32_0 : i32, i32
  }
  func.func @transform_12(%arg0: i32) -> (i32, i32) {
    %c0_i32 = arith.constant 0 : i32
    %c0_i32_0 = arith.constant 0 : i32
    %c0_i32_1 = arith.constant 0 : i32
    return %c0_i32, %c0_i32_0 : i32, i32
  }
  func.func @transform_13(%arg0: i32) -> (i32, i32, i32) {
    %c0_i32 = arith.constant 0 : i32
    %c0_i32_0 = arith.constant 0 : i32
    %c0_i32_1 = arith.constant 0 : i32
    return %arg0, %c0_i32, %c0_i32_0 : i32, i32, i32
  }
}

</mosaic_0001>

<bundles_post_ra>
// kernel: tpu_custom_call.1
= control target key start
LH: loop header
LB: loop body
LE: loop exit
PB: predicated region body
PF: predicated region fallthrough
CT: control target
= control target key end

     0   :  { %s2048_s0 = inlined_call_operand.vmem [shape: f32[2,8,32], index: 0, kind: input, shape index: {}]   ;;  %s2049_s1 = inlined_call_operand.vmem [shape: f32[1,32], index: 1, kind: input, shape index: {}]   ;;  %s2050_s2 = inlined_call_operand.vmem [shape: f32[1,32], index: 2, kind: input, shape index: {}]   ;;  %s2051_s3 = inlined_call_operand.vmem [shape: bf16[32,96], index: 3, kind: input, shape index: {}]   ;;  %s2052_s4 = inlined_call_operand.vmem [shape: f32[1,96], index: 4, kind: input, shape index: {}]   ;;  %s2053_s5 = inlined_call_operand.vmem [shape: bf16[32,32], index: 5, kind: input, shape index: {}]   ;;  %s2054_s6 = inlined_call_operand.vmem [shape: f32[1,32], index: 6, kind: input, shape index: {}]   ;;  %s2055_s7 = inlined_call_operand.vmem [shape: f32[1,32], index: 7, kind: input, shape index: {}]   ;;  %s2056_s8 = inlined_call_operand.vmem [shape: f32[1,32], index: 8, kind: input, shape index: {}]   ;;  %s2057_s9 = inlined_call_operand.vmem [shape: bf16[32,128], index: 9, kind: input, shape index: {}]   ;;  %s2058_s10 = inlined_call_operand.vmem [shape: f32[1,128], index: 10, kind: input, shape index: {}]   ;;  %s2059_s11 = inlined_call_operand.vmem [shape: bf16[128,32], index: 11, kind: input, shape index: {}]   ;;  %s2060_s12 = inlined_call_operand.vmem [shape: f32[1,32], index: 12, kind: input, shape index: {}]   ;;  %s2061_s13 = inlined_call_operand.hbm [shape: f32[2,8,32], index: 13, kind: output, shape index: {}]  }
   0x1   :  { %2062 = sst [smem:[#allocation7_spill]] %s2048_s0 }
   0x2   :  { %2063 = sst [smem:[#allocation8_spill]] %s2049_s1 }
   0x3   :  { %2064 = sst [smem:[#allocation9_spill]] %s2050_s2 }
   0x4   :  { %18 = vsyncpa [#allocation5], 0 }
   0x5   :  { %20 = vsyncpa [#allocation5 + $0x1], 0  ;;  %s1781_s25 = smov 0   ;;  %s1783_s26 = smov 0  }
   0x6   :  { %s1785_s27 = smov 0   ;;  %s1787_s28 = smov 0  }
   0x7 LB: > { %s1802_s29 = sadd.s32 4294967295, %s1692_s28   ;;  %s1367_s30 = sadd.s32 4294967294, %s1692_s28   ;;  %s1692_s28 = sphi %s1787_s28, %s2073_s28   ;;  %s1688_s27 = sphi %s1785_s27, %s2072_s27   ;;  %s1684_s26 = sphi %s1783_s26, %s2071_s26   ;;  %s1680_s25 = sphi %s1781_s25, %s2070_s25  }
   0x8   : > { %s1806_s14 = sadd.s32 1, %s1692_s28   ;;  %s311_s15 = sadd.s32 1, %s1688_s27 }
   0x9   : > { %s308_s16 = ssub.s32 %s1692_s28, %s1806_s14  ;;  %p321_p0 = scmp.ne.s32.totalorder %s1688_s27, %s1684_s26 }
   0xa   : > { %p309_p1 = scmp.eq.s32.totalorder %s308_s16, 0  ;;  %p322_p2 = scmp.eq.s32.totalorder %s1802_s29, 1 }
   0xb   : > { %p327_p3 = scmp.ne.s32.totalorder %s1684_s26, %s1680_s25  ;;  %p328_p4 = scmp.eq.s32.totalorder %s1367_s30, 1 }
   0xc   : > { %s1817_s17 = scalar_select %p309_p1, %s1688_s27, %s311_s15  }
   0xd   : > { %p1819_p5 = por %p322_p2, %p321_p0  ;;  %p1823_p6 = por %p328_p4, %p327_p3 }
   0xe   : > { %p1370_p7 = scmp.ge.s32.totalorder %s1692_s28, 1  ;;  %p389_p8 = scmp.lt.s32.totalorder %s1692_s28, 3 }
  0x10   : > { %p390_p9 = pnand %p1370_p7, %p389_p8 }
  0x11   : > { %p432_p10 = scmp.lt.s32.totalorder (!%p390_p9), %s1802_s29, 1  ;;  %s2067_s0 = sld [smem:[#allocation7_spill]] (!%p390_p9) }
  0x12   : > { %393 = sbr.rel (%p390_p9) target bundleno = 2506 (0x9ca), region = 72  ;;  %s2068_s1 = sld [smem:[#allocation8_spill]] (!%p390_p9) }
  0x13   : > { %s2069_s2 = sld [smem:[#allocation9_spill]] (!%p390_p9)  ;;  %s1696_s16 = smov (!%p390_p9), 120  }
  0x14   : > { %s1699_s22 = smov (!%p390_p9), 80   ;;  %s1700_s23 = smov (!%p390_p9), 112  }
  0x15   : > { %s1702_s30 = smov (!%p390_p9), 104   ;;  %s1703_s15 = smov (!%p390_p9), 64  }
  0x17   : > { %s433_s20 = scalar_select %p432_p10, %s1802_s29, 1  ;;  %vm440_vm0 = vcmask 261120   ;;  %v1593_v7 = vld [vmem:[%s2051_s3 + $0x8] sm:$0xff]   ;;  %v1694_v8 = vmov 0.0   ;;  %vm1695_vm1 = vmmov 0   ;;  %v1594_v9 = vld [vmem:[%s2051_s3] sm:$0xff]  }
  0x18   : > { %1446 = vmatprep.subr.bf16.mxu0 %v1694_v8  ;;  %1450 = vmatprep.mubr.msk.bf16.mxu0 %vm1695_vm1, %v1694_v8  ;;  %v1373_v14 = vld [vmem:[%s2068_s1] ss:$0 sm:$0xff]  ;;  %vm537_vm2 = vcmask 781312   ;;  %vm545_vm3 = vcmask 64512   ;;  %vm609_vm4 = vcmask 1043456   ;;  %vm999_vm5 = vcmask 130048  }
  0x19   : > { %s1372_s21 = sshll.u32 %s433_s20, 3  ;;  %1447 = vmatpush3.bf16.msra.mxu0 %v1593_v7  ;;  %1466 = vmatprep.subr.bf16.mxu1 %v1694_v8  ;;  %v1374_v16 = vld [vmem:[%s2069_s2] ss:$0 sm:$0xff]  ;;  %s1697_s20 = smov 96   ;;  %vm1002_vm6 = vcmask 195584   ;;  %vm1006_vm7 = vcmask 257024  }
  0x1a   : > { %s435_s24 = scalar_lea.vmem %s2067_s0, %s1372_s21  ;;  %1448 = vmatprep.subr.bf16.mxu0 %v1694_v8  ;;  %1468 = vmatprep.mubr.msk.bf16.mxu1 %vm1695_vm1, %v1694_v8  ;;  %v1375_v20 = vld [vmem:[%s2052_s4] ss:$0 sm:$0xff]  ;;  %s1698_s21 = smov 88  }
  0x1b   : > { %v1834_v0 = vld [vmem:[%s435_s24] sm:$0xff]  ;;  %s1701_s24 = smov 72  }
  0x1c   : > { %v441_v1 = vsel %vm440_vm0, %v1834_v0, 0.0 }
  0x1d   : > { %442 = vadd.xlane.f32.xlu0 %v441_v1  ;;  %1449 = vmatpush3.bf16.msra.mxu0 %v1594_v9 }
  0x1e   : > { %1454 = vmatprep.subr.bf16.mxu0 %v1694_v8 }
  0xa6   : > { %v443_v2 = vpop.xlane.xlu0 %442 }
  0xa7   : > { %v445_v3 = vmul.f32 0.03125, %v443_v2 }
  0xa9   : > { %v446_v4 = vsub.f32 %v1834_v0, %v445_v3 }
  0xab   : > { %v447_v5 = vmul.f32 %v446_v4, %v446_v4 }
  0xad   : > { %v448_v6 = vsel %vm440_vm0, %v447_v5, 0.0 }
  0xae   : > { %449 = vadd.xlane.f32.xlu0 %v448_v6 }
 0x137   : > { %v450_v10 = vpop.xlane.xlu0 %449 }
 0x138   : > { %v451_v11 = vmul.f32 0.03125, %v450_v10 }
 0x13a   : > { %v452_v12 = vadd.f32 1e-05, %v451_v11 }
 0x13c   : > { %1608 = vrsqrt.f32 %v452_v12 }
 0x149   : > { %v1609_v13 = vpop.eup %1608 }
 0x14a   : > { %v454_v15 = vmul.f32 %v1609_v13, %v446_v4 }
 0x14c   : > { %v461_v17 = vmul.f32 %v1373_v14, %v454_v15 }
 0x14e   : > { %v468_v18 = vadd.f32 %v1374_v16, %v461_v17 }
 0x150   : > { %v469_v19 = vpack.c.bf16 %v468_v18, %v468_v18 }
 0x152   : > { %1451 = vmatmul.mubr.msk.bf16.vlgmr.msra.gmra.mxu0 %vm440_vm0, %v469_v19 }
 0x153   : > { %1456 = vmatprep.mubr.msk.bf16.mxu0 %vm1695_vm1, %v1694_v8 }
 0x212   : > { %v530_v21 = vpop.f32.mrf.mxu0 }
 0x213   : > { %v531_v22 = vadd.f32 %v1375_v20, %v530_v21 }
 0x214   : > { %v1452_v23 = vpop.f32.mrf.mxu0 }
 0x215   : > { %v536_v24 = vpack.c.bf16 %v531_v22, %v531_v22 }
 0x216   : > { %v533_v25 = vpop.f32.mrf.mxu0 }
 0x217   : > { %538 = vst.msk [vmem:[#allocation2] sm:$0xf] %vm537_vm2, %v536_v24 }
 0x218   : > { %v1453_v26 = vpop.f32.mrf.mxu0 }
 0x21e   : > { %v539_v27 = vld [vmem:[#allocation2] sm:$0xf] }
 0x21f   : > { %v1866_v28 = vcombine.low %v539_v27, %v539_v27 }
 0x221   : > { %654 = vrot.lane.b32.xlu0 %v1866_v28, %s1696_s16  ;;  %543 = vrot.lane.b32.xlu1 %v1866_v28, %s1697_s20  ;;  %s1704_s16 = smov 56   ;;  %s1705_s20 = smov 48  }
 0x225   : > { %656 = vrot.lane.b32.xlu1 %v1866_v28, %s1698_s21  ;;  %s1706_s21 = smov 40  }
 0x229   : > { %767 = vrot.lane.b32.xlu1 %v1866_v28, %s1699_s22  ;;  %s1707_s22 = smov 8  }
 0x22d   : > { %765 = vrot.lane.b32.xlu1 %v1866_v28, %s1700_s23 }
 0x231   : > { %878 = vrot.lane.b32.xlu1 %v1866_v28, %s1701_s24 }
 0x235   : > { %876 = vrot.lane.b32.xlu1 %v1866_v28, %s1702_s30  ;;  %s429_s30 = sand.u32 1, %s1684_s26  }
 0x293   : > { %v544_v29 = vpop.permute.xlu1 %543  ;;  %v655_v34 = vpop.permute.xlu0 %654 }
 0x294   : > { %v550_v30 = vsel %vm545_vm3, %v544_v29, 0 }
 0x295   : > { %1455 = vmatpush3.bf16.xpose.msra.mxu0 %v550_v30 }
 0x296   : > { %1460 = vmatprep.subr.bf16.mxu0 %v1694_v8 }
 0x297   : > { %v657_v31 = vpop.permute.xlu1 %656 }
 0x298   : > { %v662_v32 = vsel %vm545_vm3, %v657_v31, 0 }
 0x299   : > { %1467 = vmatpush3.bf16.xpose.msra.mxu1 %v662_v32 }
 0x29a   : > { %1478 = vmatprep.subr.bf16.mxu1 %v1694_v8 }
 0x29b   : > { %v768_v33 = vpop.permute.xlu1 %767 }
 0x29c   : > { %1457 = vmatmul.mubr.msk.bf16.vlgmr.msra.gmra.mxu0 %vm545_vm3, %v539_v27  ;;  %v773_v36 = vsel %vm545_vm3, %v768_v33, 0 }
 0x29d   : > { %1462 = vmatprep.mubr.msk.bf16.mxu0 %vm1695_vm1, %v1694_v8 }
 0x29f   : > { %v766_v35 = vpop.permute.xlu1 %765 }
 0x2a0   : > { %1469 = vmatmul.mubr.msk.bf16.vlgmr.msra.gmra.mxu1 %vm545_vm3, %v655_v34 }
 0x2a1   : > { %1479 = vmatpush3.bf16.xpose.msra.mxu1 %v773_v36  ;;  %1480 = vmatprep.mubr.msk.bf16.mxu1 %vm1695_vm1, %v1694_v8 }
 0x2a2   : > { %1490 = vmatprep.subr.bf16.mxu1 %v1694_v8 }
 0x2a3   : > { %v879_v37 = vpop.permute.xlu1 %878 }
 0x2a4   : > { %v884_v38 = vsel %vm545_vm3, %v879_v37, 0 }
 0x2a7   : > { %v877_v39 = vpop.permute.xlu1 %876 }
 0x2a8   : > { %1481 = vmatmul.mubr.msk.bf16.vlgmr.msra.gmra.mxu1 %vm545_vm3, %v766_v35 }
 0x2a9   : > { %1491 = vmatpush3.bf16.xpose.msra.mxu1 %v884_v38  ;;  %1492 = vmatprep.mubr.msk.bf16.mxu1 %vm1695_vm1, %v1694_v8 }
 0x2aa   : > { %1502 = vmatprep.subr.bf16.mxu1 %v1694_v8 }
 0x2b0   : > { %1493 = vmatmul.mubr.msk.bf16.vlgmr.msra.gmra.mxu1 %vm545_vm3, %v877_v39 }
 0x2b1   : > { %1506 = vmatprep.mubr.msk.bf16.mxu1 %vm1695_vm1, %v1694_v8 }
 0x35c   : > { %v586_v40 = vpop.f32.mrf.mxu0 }
 0x35d   : > { %v592_v41 = vsel %vm545_vm3, %v586_v40, -inf }
 0x35e   : > { %593 = vmax.xlane.f32.xlu1 %v592_v41  ;;  %v1458_v42 = vpop.f32.mrf.mxu0 }
 0x360   : > { %v589_v43 = vpop.f32.mrf.mxu0  ;;  %v698_v44 = vpop.f32.mrf.mxu1 }
 0x361   : > { %v704_v45 = vsel %vm545_vm3, %v698_v44, -inf }
 0x362   : > { %705 = vmax.xlane.f32.xlu0 %v704_v45  ;;  %v1459_v46 = vpop.f32.mrf.mxu0  ;;  %v1470_v47 = vpop.f32.mrf.mxu1 }
 0x364   : > { %v701_v48 = vpop.f32.mrf.mxu1 }
 0x366   : > { %v1471_v49 = vpop.f32.mrf.mxu1 }
 0x368   : > { %v809_v50 = vpop.f32.mrf.mxu1 }
 0x369   : > { %v815_v51 = vsel %vm545_vm3, %v809_v50, -inf }
 0x36a   : > { %v1482_v52 = vpop.f32.mrf.mxu1  ;;  %816 = vmax.xlane.f32.xlu1 %v815_v51  ;;  %v1596_v51 = vld [vmem:[%s2053_s5 + $0x8] sm:$0xff]  }
 0x36b   : > { %1503 = vmatpush3.bf16.msra.mxu1 %v1596_v51 }
 0x36c   : > { %v812_v53 = vpop.f32.mrf.mxu1  ;;  %1504 = vmatprep.subr.bf16.mxu1 %v1694_v8 }
 0x36e   : > { %v1483_v54 = vpop.f32.mrf.mxu1 }
 0x36f   : > { %v1597_v54 = vld [vmem:[%s2053_s5] sm:$0xff]  }
 0x370   : > { %v920_v55 = vpop.f32.mrf.mxu1  ;;  %1505 = vmatpush3.bf16.msra.mxu1 %v1597_v54 }
 0x371   : > { %v926_v56 = vsel %vm545_vm3, %v920_v55, -inf  ;;  %1518 = vmatprep.subr.bf16.mxu1 %v1694_v8 }
 0x372   : > { %927 = vmax.xlane.f32.xlu0 %v926_v56  ;;  %v1494_v57 = vpop.f32.mrf.mxu1 }
 0x374   : > { %v923_v58 = vpop.f32.mrf.mxu1 }
 0x376   : > { %v1495_v59 = vpop.f32.mrf.mxu1 }
 0x3e7   : > { %v594_v60 = vpop.xlane.xlu1 %593 }
 0x3e8   : > { %v595_v61 = vsub.f32 %v586_v40, %v594_v60 }
 0x3ea   : > { %v596_v62 = vmul.f32 1.442695, %v595_v61 }
 0x3eb   : > { %v706_v63 = vpop.xlane.xlu0 %705 }
 0x3ec   : > { %1610 = vpow2.f32 %v596_v62  ;;  %v707_v1 = vsub.f32 %v698_v44, %v706_v63 }
 0x3ee   : > { %v708_v2 = vmul.f32 1.442695, %v707_v1 }
 0x3f0   : > { %1612 = vpow2.f32 %v708_v2 }
 0x3f3   : > { %v817_v13 = vpop.xlane.xlu1 %816 }
 0x3f4   : > { %v818_v14 = vsub.f32 %v809_v50, %v817_v13 }
 0x3f6   : > { %v819_v15 = vmul.f32 1.442695, %v818_v14 }
 0x3f9   : > { %v1611_v3 = vpop.eup %1610 }
 0x3fa   : > { %v598_v4 = vsel %vm545_vm3, %v1611_v3, 0.0 }
 0x3fb   : > { %v928_v5 = vpop.xlane.xlu0 %927  ;;  %599 = vadd.xlane.f32.xlu1 %v598_v4 }
 0x3fc   : > { %v929_v6 = vsub.f32 %v920_v55, %v928_v5 }
 0x3fd   : > { %v1613_v7 = vpop.eup %1612 }
 0x3fe   : > { %v930_v9 = vmul.f32 1.442695, %v929_v6  ;;  %v710_v10 = vsel %vm545_vm3, %v1613_v7, 0.0 }
 0x3ff   : > { %711 = vadd.xlane.f32.xlu0 %v710_v10 }
 0x400   : > { %1614 = vpow2.f32 %v930_v9  ;;  %v1388_v9 = vld [vmem:[%s2054_s6] ss:$0 sm:$0xff] }
 0x401   : > { %1616 = vpow2.f32 %v819_v15 }
 0x40c   : > { %604 = vrot.lane.b32.xlu1 %v1866_v28, %s1703_s15  ;;  %s1371_s15 = sshll.u32 %s429_s30, 3 }
 0x40d   : > { %v1615_v11 = vpop.eup %1614 }
 0x40e   : > { %v932_v12 = vsel %vm545_vm3, %v1615_v11, 0.0  ;;  %v1617_v16 = vpop.eup %1616 }
 0x40f   : > { %933 = vadd.xlane.f32.xlu0 %v932_v12  ;;  %v821_v17 = vsel %vm545_vm3, %v1617_v16, 0.0 }
 0x425   : > { %716 = vrot.lane.b32.xlu0 %v1866_v28, %s1704_s16  ;;  %s1708_s16 = smov 16  }
 0x430   : > { %822 = vadd.xlane.f32.xlu1 %v821_v17 }
 0x441   : > { %827 = vrot.lane.b32.xlu1 %v1866_v28, %s1705_s20  ;;  %s1709_s20 = smov 24  }
 0x445   : > { %938 = vrot.lane.b32.xlu1 %v1866_v28, %s1706_s21  ;;  %s1409_s21 = sshll.u32 %s1802_s29, 7  ;;  %s1295_s29 = scalar_lea.sflag [#allocation5], %s429_s30 }
 0x446   : > { %s2006_s1 = scalar_lea.hbm %s2061_s13, %s1409_s21 }
 0x484   : > { %v600_v18 = vpop.xlane.xlu1 %599 }
 0x485   : > { %1618 = vrcp.f32 %v600_v18 }
 0x488   : > { %v712_v19 = vpop.xlane.xlu0 %711  ;;  %v605_v20 = vpop.permute.xlu1 %604 }
 0x489   : > { %v611_v21 = vsel %vm609_vm4, %v605_v20, 0  ;;  %1620 = vrcp.f32 %v712_v19 }
 0x48a   : > { %1461 = vmatpush3.bf16.msra.mxu0 %v611_v21 }
 0x48b   : > { %1472 = vmatprep.subr.bf16.mxu0 %v1694_v8 }
 0x492   : > { %v1619_v22 = vpop.eup %1618 }
 0x493   : > { %v602_v23 = vmul.f32 %v1619_v22, %v1611_v3  ;;  %v1598_v22 = vld [vmem:[%s2057_s9 + $0x8] sm:$0xff]  }
 0x495   : > { %v603_v24 = vpack.c.bf16 %v602_v23, %v602_v23 }
 0x496   : > { %v1621_v25 = vpop.eup %1620 }
 0x497   : > { %1463 = vmatmul.mubr.msk.bf16.vlgmr.msra.gmra.mxu0 %vm545_vm3, %v603_v24  ;;  %v714_v27 = vmul.f32 %v1621_v25, %v1613_v7 }
 0x498   : > { %v934_v26 = vpop.xlane.xlu0 %933  ;;  %1474 = vmatprep.mubr.msk.bf16.mxu0 %vm1695_vm1, %v1694_v8 }
 0x499   : > { %v715_v30 = vpack.c.bf16 %v714_v27, %v714_v27  ;;  %v1392_v27 = vld [vmem:[%s2055_s7] ss:$0 sm:$0xff] }
 0x49c   : > { %v717_v28 = vpop.permute.xlu0 %716 }
 0x49d   : > { %v722_v29 = vsel %vm609_vm4, %v717_v28, 0 }
 0x49e   : > { %1473 = vmatpush3.bf16.msra.mxu0 %v722_v29  ;;  %v1393_v29 = vld [vmem:[%s2056_s8] ss:$0 sm:$0xff] }
 0x49f   : > { %1484 = vmatprep.subr.bf16.mxu0 %v1694_v8 }
 0x4a1   : > { %1475 = vmatmul.mubr.msk.bf16.vlgmr.msra.gmra.mxu0 %vm545_vm3, %v715_v30 }
 0x4a2   : > { %1486 = vmatprep.mubr.msk.bf16.mxu0 %vm1695_vm1, %v1694_v8 }
 0x4b9   : > { %v823_v31 = vpop.xlane.xlu1 %822 }
 0x4ba   : > { %1622 = vrcp.f32 %v823_v31 }
 0x4bb   : > { %1624 = vrcp.f32 %v934_v26 }
 0x4bd   : > { %v828_v32 = vpop.permute.xlu1 %827 }
 0x4be   : > { %v833_v33 = vsel %vm609_vm4, %v828_v32, 0 }
 0x4bf   : > { %1485 = vmatpush3.bf16.msra.mxu0 %v833_v33  ;;  %v1600_v33 = vld [vmem:[%s2059_s11 + $0x38] sm:$0xff]  }
 0x4c0   : > { %1496 = vmatprep.subr.bf16.mxu0 %v1694_v8 }
 0x4c1   : > { %v939_v36 = vpop.permute.xlu1 %938 }
 0x4c2   : > { %v944_v39 = vsel %vm609_vm4, %v939_v36, 0  ;;  %v1603_v36 = vld [vmem:[%s2059_s11 + $0x20] sm:$0xff]  }
 0x4c7   : > { %v1623_v34 = vpop.eup %1622 }
 0x4c8   : > { %v825_v35 = vmul.f32 %v1623_v34, %v1617_v16  ;;  %v1625_v38 = vpop.eup %1624  ;;  %v1601_v34 = vld [vmem:[%s2059_s11 + $0x30] sm:$0xff]  }
 0x4c9   : > { %v936_v40 = vmul.f32 %v1625_v38, %v1615_v11  ;;  %v1605_v38 = vld [vmem:[%s2059_s11 + $0x10] sm:$0xff]  }
 0x4ca   : > { %v826_v37 = vpack.c.bf16 %v825_v35, %v825_v35  ;;  %v1602_v35 = vld [vmem:[%s2059_s11 + $0x28] sm:$0xff]  }
 0x4cb   : > { %v937_v41 = vpack.c.bf16 %v936_v40, %v936_v40  ;;  %v1607_v40 = vld [vmem:[%s2059_s11] sm:$0xff]  }
 0x4cc   : > { %1487 = vmatmul.mubr.msk.bf16.vlgmr.msra.gmra.mxu0 %vm545_vm3, %v826_v37  ;;  %v1604_v37 = vld [vmem:[%s2059_s11 + $0x18] sm:$0xff]  }
 0x4cd   : > { %1497 = vmatpush3.bf16.msra.mxu0 %v944_v39  ;;  %1498 = vmatprep.mubr.msk.bf16.mxu0 %vm1695_vm1, %v1694_v8  ;;  %v1606_v39 = vld [vmem:[%s2059_s11 + $0x8] sm:$0xff]  }
 0x4ce   : > { %1510 = vmatprep.subr.bf16.mxu0 %v1694_v8 }
 0x4d4   : > { %1499 = vmatmul.mubr.msk.bf16.vlgmr.msra.gmra.mxu0 %vm545_vm3, %v937_v41  ;;  %v1394_v41 = vld [vmem:[%s2058_s10] ss:$0 sm:$0xff] }
 0x4d5   : > { %1514 = vmatprep.mubr.msk.bf16.mxu0 %vm1695_vm1, %v1694_v8  ;;  %1511 = vmatpush3.bf16.msra.mxu0 %v1598_v22 }
 0x4d6   : > { %1512 = vmatprep.subr.bf16.mxu0 %v1694_v8 }
 0x557   : > { %v647_v42 = vpop.f32.mrf.mxu0 }
 0x558   : > { %v653_v1 = vpack.c.bf16 %v647_v42, %v647_v42 }
 0x559   : > { %v1464_v43 = vpop.f32.mrf.mxu0 }
 0x55b   : > { %v650_v44 = vpop.f32.mrf.mxu0 }
 0x55d   : > { %v1465_v45 = vpop.f32.mrf.mxu0 }
 0x561   : > { %v758_v46 = vpop.f32.mrf.mxu0 }
 0x562   : > { %v764_v47 = vpack.c.bf16 %v758_v46, %v758_v46 }
 0x563   : > { %v1476_v48 = vpop.f32.mrf.mxu0 }
 0x564   : > { %988 = vrot.lane.b32.xlu0 %v764_v47, %s1707_s22  ;;  %s431_s22 = scalar_lea.vmem [#allocation4], %s1371_s15 }
 0x565   : > { %v761_v49 = vpop.f32.mrf.mxu0  ;;  %s1308_s23 = sshll.u32 %s431_s22, 4  ;;  %s2008_s23 = int_to_ptr.vmem [resolvable:$true] %s1308_s23 }
 0x566   : > { %s1632_s15 = scalar_lea.vmem %s2008_s23, 128 }
 0x567   : > { %v1477_v50 = vpop.f32.mrf.mxu0  ;;  %p1633_p11 = scmp.ne.s32.totalorder %s2008_s23, %s1632_s15 }
 0x569   : > { %p1634_p12 = pnand %p1633_p11, %p1819_p5 }
 0x56b   : > { %p1635_p13 = pneg %p1634_p12 }
 0x58c   : > { %v869_v52 = vpop.f32.mrf.mxu0 }
 0x58d   : > { %v875_v53 = vpack.c.bf16 %v869_v52, %v869_v52 }
 0x58e   : > { %v1488_v55 = vpop.f32.mrf.mxu0 }
 0x58f   : > { %991 = vrot.lane.b32.xlu1 %v875_v53, %s1708_s16  ;;  %v1399_v53 = vld [vmem:[%s2060_s12] ss:$0 sm:$0xff]  ;;  %s1710_s16 = smov [#allocation4]  }
 0x590   : > { %v872_v56 = vpop.f32.mrf.mxu0 }
 0x592   : > { %v1489_v57 = vpop.f32.mrf.mxu0 }
 0x594   : > { %v980_v58 = vpop.f32.mrf.mxu0 }
 0x595   : > { %v986_v59 = vpack.c.bf16 %v980_v58, %v980_v58 }
 0x596   : > { %v1500_v60 = vpop.f32.mrf.mxu0 }
 0x597   : > { %994 = vrot.lane.b32.xlu0 %v986_v59, %s1709_s20  ;;  %s1636_s20 = sshll.u32 %s1710_s16, 4  ;;  %s1637_s20 = int_to_ptr.vmem [resolvable:$false] %s1636_s20 }
 0x598   : > { %v983_v61 = vpop.f32.mrf.mxu0  ;;  %s1638_s0 = scalar_lea.vmem %s1637_s20, 256  ;;  %p1639_p0 = scmp.lt.s32.totalorder %s2008_s23, %s1637_s20 }
 0x599   : > { %p1640_p1 = scmp.lt.s32.totalorder %s1638_s0, %s1632_s15 }
 0x59a   : > { %v1501_v62 = vpop.f32.mrf.mxu0 }
 0x59b   : > { %p1641_p2 = por %p1640_p1, %p1639_p0 }
 0x59d   : > { %p1642_p3 = pnand %p1641_p2, %p1635_p13 }
 0x5d6   : > { %v989_v63 = vpop.permute.xlu0 %988 }
 0x5d7   : > { %v998_v3 = vsel %vm545_vm3, %v653_v1, %v989_v63 }
 0x601   : > { %v992_v2 = vpop.permute.xlu1 %991 }
 0x602   : > { %v1001_v4 = vsel %vm999_vm5, %v998_v3, %v992_v2 }
 0x609   : > { %v995_v5 = vpop.permute.xlu0 %994 }
 0x60a   : > { %v1004_v6 = vsel %vm1002_vm6, %v1001_v4, %v995_v5 }
 0x60b   : > { %1007 = vst.msk [vmem:[#allocation3] sm:$0xf] %vm1006_vm7, %v1004_v6 }
 0x612   : > { %v1008_v7 = vld [vmem:[#allocation3] sm:$0xf] }
 0x613   : > { %1507 = vmatmul.mubr.msk.bf16.vlgmr.msra.gmra.mxu1 %vm440_vm0, %v1008_v7 }
 0x614   : > { %1534 = vmatprep.mubr.msk.bf16.mxu1 %vm1695_vm1, %v1694_v8  ;;  %1519 = vmatpush3.bf16.msra.mxu1 %v1600_v33 }
 0x615   : > { %1520 = vmatprep.subr.bf16.mxu1 %v1694_v8 }
 0x618   : > { %1521 = vmatpush3.bf16.msra.mxu1 %v1601_v34 }
 0x619   : > { %1522 = vmatprep.subr.bf16.mxu1 %v1694_v8 }
 0x61c   : > { %1523 = vmatpush3.bf16.msra.mxu1 %v1602_v35 }
 0x61d   : > { %1524 = vmatprep.subr.bf16.mxu1 %v1694_v8 }
 0x620   : > { %1525 = vmatpush3.bf16.msra.mxu1 %v1603_v36 }
 0x621   : > { %1526 = vmatprep.subr.bf16.mxu1 %v1694_v8 }
 0x624   : > { %1527 = vmatpush3.bf16.msra.mxu1 %v1604_v37 }
 0x625   : > { %1528 = vmatprep.subr.bf16.mxu1 %v1694_v8 }
 0x628   : > { %1529 = vmatpush3.bf16.msra.mxu1 %v1605_v38 }
 0x629   : > { %1530 = vmatprep.subr.bf16.mxu1 %v1694_v8 }
 0x62c   : > { %1531 = vmatpush3.bf16.msra.mxu1 %v1606_v39 }
 0x62d   : > { %1532 = vmatprep.subr.bf16.mxu1 %v1694_v8 }
 0x630   : > { %1533 = vmatpush3.bf16.msra.mxu1 %v1607_v40 }
 0x6d3   : > { %v1069_v10 = vpop.f32.mrf.mxu1 }
 0x6d4   : > { %v1070_v11 = vadd.f32 %v1388_v9, %v1069_v10 }
 0x6d5   : > { %v1508_v12 = vpop.f32.mrf.mxu1 }
 0x6d6   : > { %v1943_v13 = vadd.f32 %v1070_v11, %v1834_v0  ;;  %v1599_v0 = vld [vmem:[%s2057_s9] sm:$0xff]  }
 0x6d7   : > { %v1072_v14 = vpop.f32.mrf.mxu1  ;;  %1513 = vmatpush3.bf16.msra.mxu0 %v1599_v0 }
 0x6d8   : > { %v1078_v15 = vsel %vm440_vm0, %v1943_v13, 0.0 }
 0x6d9   : > { %1079 = vadd.xlane.f32.xlu1 %v1078_v15  ;;  %v1509_v16 = vpop.f32.mrf.mxu1 }
 0x762   : > { %v1080_v17 = vpop.xlane.xlu1 %1079 }
 0x763   : > { %v1081_v18 = vmul.f32 0.03125, %v1080_v17 }
 0x765   : > { %v1082_v19 = vsub.f32 %v1943_v13, %v1081_v18 }
 0x767   : > { %v1083_v20 = vmul.f32 %v1082_v19, %v1082_v19 }
 0x769   : > { %v1084_v21 = vsel %vm440_vm0, %v1083_v20, 0.0 }
 0x76a   : > { %1085 = vadd.xlane.f32.xlu0 %v1084_v21 }
 0x7f3   : > { %v1086_v23 = vpop.xlane.xlu0 %1085 }
 0x7f4   : > { %v1087_v24 = vmul.f32 0.03125, %v1086_v23 }
 0x7f6   : > { %v1088_v25 = vadd.f32 1e-05, %v1087_v24 }
 0x7f8   : > { %1626 = vrsqrt.f32 %v1088_v25 }
 0x805   : > { %v1627_v26 = vpop.eup %1626 }
 0x806   : > { %v1090_v28 = vmul.f32 %v1627_v26, %v1082_v19 }
 0x808   : > { %v1097_v30 = vmul.f32 %v1392_v27, %v1090_v28 }
 0x80a   : > { %v1104_v31 = vadd.f32 %v1393_v29, %v1097_v30 }
 0x80c   : > { %v1105_v32 = vpack.c.bf16 %v1104_v31, %v1104_v31 }
 0x80e   : > { %1515 = vmatmul.mubr.msk.bf16.vlgmr.msra.gmra.mxu0 %vm440_vm0, %v1105_v32 }
 0x8ce   : > { %v1166_v42 = vpop.f32.mrf.mxu0 }
 0x8cf   : > { %v1167_v43 = vadd.f32 %v1394_v41, %v1166_v42 }
 0x8d0   : > { %v1516_v44 = vpop.f32.mrf.mxu0 }
 0x8d1   : > { %v1398_v45 = vmul.f32 -1.702, %v1167_v43 }
 0x8d2   : > { %v1169_v46 = vpop.f32.mrf.mxu0 }
 0x8d3   : > { %v1174_v47 = vmul.f32 1.442695, %v1398_v45 }
 0x8d4   : > { %v1517_v48 = vpop.f32.mrf.mxu0 }
 0x8d5   : > { %1628 = vpow2.f32 %v1174_v47 }
 0x8e2   : > { %v1629_v8 = vpop.eup %1628 }
 0x8e3   : > { %v1176_v49 = vadd.f32 1.0, %v1629_v8 }
 0x8e5   : > { %1630 = vrcp.f32 %v1176_v49 }
 0x8f2   : > { %v1631_v50 = vpop.eup %1630 }
 0x8f3   : > { %v1179_v51 = vmul.f32 %v1631_v50, %v1167_v43 }
 0x8f5   : > { %v1180_v52 = vpack.c.bf16 %v1179_v51, %v1179_v51 }
 0x8f7   : > { %1535 = vmatmul.mubr.bf16.vlgmr.msra.gmra.mxu1 %v1180_v52 }
 0x9b7   : > { %v1286_v54 = vpop.f32.mrf.mxu1 }
 0x9b8   : > { %v1287_v55 = vadd.f32 %v1399_v53, %v1286_v54 }
 0x9b9   : > { %v1536_v56 = vpop.f32.mrf.mxu1 }
 0x9ba   : > { %v1292_v57 = vadd.f32 %v1287_v55, %v1943_v13 }
 0x9bb   : > { %v1289_v58 = vpop.f32.mrf.mxu1 }
 0x9bc   : > { %1293 = vst.msk [vmem:[%s431_s22] sm:$0xff] %vm440_vm0, %v1292_v57 }
 0x9bd   : > { %v1537_v59 = vpop.f32.mrf.mxu1 }
 0x9be   : > { %1645 = shalt.err (!%p1642_p3)
}
 0x9bf   : > { %s1646_s21 = scalar_lea.hbm %s2006_s1, 128  ;;  %s1650_s24 = scalar_lea.hbm %s2061_s13, 256 }
 0x9c0   : > { %p1647_p4 = scmp.ne.s32.totalorder %s2006_s1, %s1646_s21  ;;  %p1651_p9 = scmp.lt.s32.totalorder %s2006_s1, %s2061_s13 }
 0x9c1   : > { %p1652_p10 = scmp.lt.s32.totalorder %s1650_s24, %s1646_s21 }
 0x9c2   : > { %p1648_p7 = pnand %p1647_p4, %p1819_p5 }
 0x9c3   : > { %p1653_p11 = por %p1652_p10, %p1651_p9 }
 0x9c4   : > { %p1649_p8 = pneg %p1648_p7 }
 0x9c6   : > { %p1654_p12 = pnand %p1653_p11, %p1649_p8 }
 0x9c8   : > { %1657 = shalt.err (!%p1654_p12)
}
 0x9c9   : > { %1538 = dma.vmem_to_hbm [thread:$0]  (%p1819_p5), %s2008_s23, 128, %s2006_s1, %s1295_s29  }
 0x9ca PF: > { %p1544_p13 = scmp.ge.s32.totalorder %s1692_s28, 2  ;;  %s1320_s15 = sand.u32 1, %s1680_s25  }
 0x9cb   : > { %s1321_s2 = scalar_lea.sflag [#allocation5], %s1320_s15 }
 0x9cc   : > { %p1541_p0 = pnand %p1544_p13, %p1823_p6 }
 0x9ce   : > { %p1542_p1 = pneg %p1541_p0 }
 0x9d0   : > { %1675 = dma.done.wait (%p1542_p1), %s1321_s2, 128  }
 0x9d1   : > { %1677 = vsyncadd (%p1542_p1), %s1321_s2, 4294967168  ;;  %p23_p2 = scmp.ge.s32.totalorder %s1806_s14, 4   ;;  %s2070_s25 = smov %s1684_s26 }
 0x9d2   : > { %s2071_s26 = smov %s1688_s27  ;;  %s2072_s27 = smov %s1817_s17 }
 0x9d3   : > { %s2073_s28 = smov %s1806_s14  ;;  %25 = sbr.rel (!%p23_p2) target bundleno = 7 (0x7), region = 107 }
 0x9d8   :  { %1326 = vsyncpa [#allocation5], 1 }
 0x9d9   :  { %1328 = vsyncpa [#allocation5 + $0x1], 1 }

</bundles_post_ra>
